<compile_context>
chip_gen: v7x
topology: tpu7x:2x2x1
jax: 0.10.0
libtpu: 0.0.40
codegen_flags: <defaults>
</compile_context>

<pallas_src>
import jax
import jax.numpy as jnp
from jax.experimental import pallas as pl
from jax.experimental.pallas import tpu as pltpu


def _make_quantile_loss_kernel(quantiles, *, batch, n_elems, tile_b, n_steps):
    taus = tuple(float(t) for t in quantiles)
    scale = 2.0 / float(n_elems)
    need_mask = (batch % tile_b) != 0

    def kernel(y_true_ref, y_preds_ref, out_ref, acc_ref):
        # y_true_ref : (1, TB)  input dtype
        # y_preds_ref: (Q, TB)  input dtype
        # out_ref    : (1, 1)   f32
        # acc_ref    : (1, TB)  f32 VMEM scratch (persists across grid steps)
        i = pl.program_id(0)

        @pl.when(i == 0)
        def _init():
            acc_ref[...] = jnp.zeros_like(acc_ref)

        y_true = y_true_ref[...].astype(jnp.float32)  # (1, TB)

        # Compile-time unrolled loop over quantiles; tau is a Python scalar,
        # so no non-scalar constants are captured by the kernel.
        partial = None
        for qi, tau in enumerate(taus):
            y_q = y_preds_ref[qi:qi + 1, :].astype(jnp.float32)  # (1, TB)
            e = y_true - y_q
            term = jnp.maximum(tau * e, (tau - 1.0) * e)          # pinball loss
            partial = term if partial is None else partial + term

        if need_mask:
            # Zero out lanes past the true batch size (only on ragged tiles).
            col = jax.lax.broadcasted_iota(jnp.int32, partial.shape, 1)
            valid = (col + i * tile_b) < batch
            partial = jnp.where(valid, partial, 0.0)

        acc_ref[...] += partial

        @pl.when(i == n_steps - 1)
        def _finalize():
            out_ref[...] = jnp.sum(acc_ref[...], keepdims=True) * scale

    return kernel


def quantile_loss(y_preds: jax.Array, y_true: jax.Array, quantiles,
                  *, tile_b: int = 4096) -> jax.Array:
    """Pallas equivalent of QuantileLoss(quantiles)(y_preds, y_true).

    y_preds: (B, Q) float (any float dtype; upcast to f32 inside the kernel)
    y_true : (B,)   float
    Returns a scalar float32: 2 * mean(pinball(y_true - y_preds, tau)).
    """
    B, Q = y_preds.shape
    assert len(quantiles) == Q, "Number of predictions must match number of quantiles"

    # Lane-dense layout: batch on the 128-lane (last) axis.
    y_preds_t = jnp.transpose(y_preds)        # (Q, B)
    y_true_t = jnp.reshape(y_true, (1, B))    # (1, B)

    # Tile size: a multiple of 128 lanes, no larger than needed for B.
    b_round = pl.cdiv(B, 128) * 128
    TB = max(128, min((tile_b // 128) * 128, b_round))
    n_steps = pl.cdiv(B, TB)

    kernel = _make_quantile_loss_kernel(
        quantiles, batch=B, n_elems=B * Q, tile_b=TB, n_steps=n_steps)

    out = pl.pallas_call(
        kernel,
        out_shape=jax.ShapeDtypeStruct((1, 1), jnp.float32),
        grid_spec=pltpu.PrefetchScalarGridSpec(
            num_scalar_prefetch=0,
            grid=(n_steps,),
            in_specs=[
                pl.BlockSpec((1, TB), lambda i: (0, i)),   # y_true  (1, B)
                pl.BlockSpec((Q, TB), lambda i: (0, i)),   # y_preds (Q, B)
            ],
            out_specs=pl.BlockSpec((1, 1), lambda i: (0, 0)),  # resident tile
            scratch_shapes=[pltpu.VMEM((1, TB), jnp.float32)],
        ),
        compiler_params=pltpu.CompilerParams(
            dimension_semantics=("arbitrary",),   # reduction over B tiles
            vmem_limit_bytes=32 * 1024 * 1024,    # tiny usage; safe on v5e/v6e/v7x
        ),
    )(y_true_t, y_preds_t)
    return out[0, 0]


def _reference(y_preds, y_true, quantiles):
    # Pure-JAX mirror of the PyTorch module (same where-based formulation).
    errors = y_true[:, None].astype(jnp.float32) - y_preds.astype(jnp.float32)
    taus = jnp.asarray(quantiles, dtype=jnp.float32)[None, :]
    losses = jnp.where(errors > 0, taus * errors, (taus - 1.0) * errors)
    return 2.0 * jnp.mean(losses)


if __name__ == "__main__":
    key = jax.random.PRNGKey(0)
    k1, k2, k3, k4 = jax.random.split(key, 4)

    quantiles = [0.1, 0.5, 0.9]

    # Small case matching the module's spec: (B,) targets, (B, Q) predictions.
    B, Q = 8, len(quantiles)
    y_true = jax.random.normal(k1, (B,), dtype=jnp.float32)
    y_preds = jax.random.normal(k2, (B, Q), dtype=jnp.float32)

    loss = quantile_loss(y_preds, y_true, quantiles)
    jax.block_until_ready(loss)
    ref = _reference(y_preds, y_true, quantiles)
    assert jnp.allclose(loss, ref, rtol=1e-5, atol=1e-6), (loss, ref)

    # Larger, non-multiple-of-128 batch exercising multi-step accumulation,
    # the in-kernel remainder mask, and the bf16 DMA path (upcast in-kernel).
    B2 = 1000
    y_true2 = jax.random.normal(k3, (B2,), dtype=jnp.float32).astype(jnp.bfloat16)
    y_preds2 = jax.random.normal(k4, (B2, Q), dtype=jnp.float32).astype(jnp.bfloat16)

    loss2 = quantile_loss(y_preds2, y_true2, quantiles, tile_b=256)
    jax.block_until_ready(loss2)
    ref2 = _reference(y_preds2, y_true2, quantiles)
    assert jnp.allclose(loss2, ref2, rtol=1e-2, atol=1e-3), (loss2, ref2)

    print("KERNEL_OK")
</pallas_src>

<mosaic_0001>
module attributes {stable_mosaic.version = 11 : i64} {
  func.func @kernel(%arg0: i32, %arg1: memref<1x128xf32, #tpu.memory_space<vmem>>, %arg2: memref<3x128xf32, #tpu.memory_space<vmem>>, %arg3: memref<1x1xf32, #tpu.memory_space<vmem>>, %arg4: memref<1x128xf32, #tpu.memory_space<vmem>>) attributes {dimension_semantics = [#tpu.dimension_semantics<arbitrary>], iteration_bounds = array<i64: 1>, scalar_prefetch = 0 : i64, scratch_operands = 1 : i64, tpu.core_type = #tpu.core_type<tc>, window_params = [{transform_indices = @transform_0, window_bounds = array<i64: 1, 128>}, {transform_indices = @transform_1, window_bounds = array<i64: 3, 128>}, {pipeline_mode = #tpu.pipeline_mode<synchronous>, transform_indices = @transform_2, window_bounds = array<i64: 1, 1>}]} {
    %c0_i32 = arith.constant 0 : i32
    %0 = arith.cmpi eq, %arg0, %c0_i32 : i32
    %1 = arith.extui %0 : i1 to i32
    %c0_i32_0 = arith.constant 0 : i32
    %2 = arith.cmpi ne, %1, %c0_i32_0 : i32
    scf.if %2 {
      %cst_18 = arith.constant 0.000000e+00 : f32
      %41 = vector.broadcast %cst_18 : f32 to vector<1x128xf32>
      %c0_19 = arith.constant 0 : index
      %c0_20 = arith.constant 0 : index
      %42 = vector.load %arg4[%c0_19, %c0_20] : memref<1x128xf32, #tpu.memory_space<vmem>>, vector<1x128xf32>
      tpu.vector_store %arg4[%c0_19, %c0_20], %41 {strides = array<i32>} : memref<1x128xf32, #tpu.memory_space<vmem>>, vector<1x128xf32>,
    } else {
    }
    %c0 = arith.constant 0 : index
    %c0_1 = arith.constant 0 : index
    %3 = vector.load %arg1[%c0, %c0_1] : memref<1x128xf32, #tpu.memory_space<vmem>>, vector<1x128xf32>
    %c0_2 = arith.constant 0 : index
    %c0_3 = arith.constant 0 : index
    %4 = vector.load %arg2[%c0_2, %c0_3] : memref<3x128xf32, #tpu.memory_space<vmem>>, vector<1x128xf32>
    %5 = arith.subf %3, %4 : vector<1x128xf32>
    %cst = arith.constant 1.000000e-01 : f32
    %6 = vector.broadcast %cst : f32 to vector<1x128xf32>
    %7 = arith.mulf %6, %5 : vector<1x128xf32>
    %cst_4 = arith.constant -0.899999976 : f32
    %8 = vector.broadcast %cst_4 : f32 to vector<1x128xf32>
    %9 = arith.mulf %8, %5 : vector<1x128xf32>
    %10 = arith.maximumf %7, %9 : vector<1x128xf32>
    %c1 = arith.constant 1 : index
    %c0_5 = arith.constant 0 : index
    %11 = vector.load %arg2[%c1, %c0_5] : memref<3x128xf32, #tpu.memory_space<vmem>>, vector<1x128xf32>
    %12 = arith.subf %3, %11 : vector<1x128xf32>
    %cst_6 = arith.constant 5.000000e-01 : f32
    %13 = vector.broadcast %cst_6 : f32 to vector<1x128xf32>
    %14 = arith.mulf %13, %12 : vector<1x128xf32>
    %cst_7 = arith.constant -5.000000e-01 : f32
    %15 = vector.broadcast %cst_7 : f32 to vector<1x128xf32>
    %16 = arith.mulf %15, %12 : vector<1x128xf32>
    %17 = arith.maximumf %14, %16 : vector<1x128xf32>
    %18 = arith.addf %10, %17 : vector<1x128xf32>
    %c2 = arith.constant 2 : index
    %c0_8 = arith.constant 0 : index
    %19 = vector.load %arg2[%c2, %c0_8] : memref<3x128xf32, #tpu.memory_space<vmem>>, vector<1x128xf32>
    %20 = arith.subf %3, %19 : vector<1x128xf32>
    %cst_9 = arith.constant 0.899999976 : f32
    %21 = vector.broadcast %cst_9 : f32 to vector<1x128xf32>
    %22 = arith.mulf %21, %20 : vector<1x128xf32>
    %cst_10 = arith.constant -1.000000e-01 : f32
    %23 = vector.broadcast %cst_10 : f32 to vector<1x128xf32>
    %24 = arith.mulf %23, %20 : vector<1x128xf32>
    %25 = arith.maximumf %22, %24 : vector<1x128xf32>
    %26 = arith.addf %18, %25 : vector<1x128xf32>
    %27 = tpu.iota {dimensions = array<i32: 1>} : vector<1x128xi32>
    %c128_i32 = arith.constant 128 : i32
    %28 = arith.muli %arg0, %c128_i32 : i32
    %29 = vector.broadcast %28 : i32 to vector<1x128xi32>
    %30 = arith.addi %27, %29 : vector<1x128xi32>
    %c8_i32 = arith.constant 8 : i32
    %31 = vector.broadcast %c8_i32 : i32 to vector<1x128xi32>
    %32 = arith.cmpi slt, %30, %31 : vector<1x128xi32>
    %cst_11 = arith.constant 0.000000e+00 : f32
    %33 = vector.broadcast %cst_11 : f32 to vector<1x128xf32>
    %34 = arith.select %32, %26, %33 : vector<1x128xi1>, vector<1x128xf32>
    %c0_12 = arith.constant 0 : index
    %c0_13 = arith.constant 0 : index
    %35 = vector.load %arg4[%c0_12, %c0_13] : memref<1x128xf32, #tpu.memory_space<vmem>>, vector<1x128xf32>
    %36 = arith.addf %35, %34 : vector<1x128xf32>
    %c0_14 = arith.constant 0 : index
    %c0_15 = arith.constant 0 : index
    %37 = vector.load %arg4[%c0_14, %c0_15] : memref<1x128xf32, #tpu.memory_space<vmem>>, vector<1x128xf32>
    tpu.vector_store %arg4[%c0_14, %c0_15], %36 {strides = array<i32>} : memref<1x128xf32, #tpu.memory_space<vmem>>, vector<1x128xf32>,
    %c0_i32_16 = arith.constant 0 : i32
    %38 = arith.cmpi eq, %arg0, %c0_i32_16 : i32
    %39 = arith.extui %38 : i1 to i32
    %c0_i32_17 = arith.constant 0 : i32
    %40 = arith.cmpi ne, %39, %c0_i32_17 : i32
    scf.if %40 {
      %c0_18 = arith.constant 0 : index
      %c0_19 = arith.constant 0 : index
      %41 = vector.load %arg4[%c0_18, %c0_19] : memref<1x128xf32, #tpu.memory_space<vmem>>, vector<1x128xf32>
      %42 = vector.shape_cast %41 : vector<1x128xf32> to vector<1x1x128xf32>
      %cst_20 = arith.constant dense<0.000000e+00> : vector<1xf32>
      %43 = vector.multi_reduction <add>, %42, %cst_20 [1, 2] : vector<1x1x128xf32> to vector<1xf32>
      %44 = vector.shape_cast %43 : vector<1xf32> to vector<1x1x1xf32>
      %45 = vector.extract %44[0, 0, 0] : f32 from vector<1x1x1xf32>
      %46 = vector.broadcast %45 : f32 to vector<1x1xf32>
      %cst_21 = arith.constant 0.0833333358 : f32
      %47 = vector.broadcast %cst_21 : f32 to vector<1x1xf32>
      %48 = arith.mulf %46, %47 : vector<1x1xf32>
      %c0_22 = arith.constant 0 : index
      %c0_23 = arith.constant 0 : index
      %49 = vector.load %arg3[%c0_22, %c0_23] : memref<1x1xf32, #tpu.memory_space<vmem>>, vector<1x1xf32>
      tpu.vector_store %arg3[%c0_22, %c0_23], %48 {strides = array<i32>} : memref<1x1xf32, #tpu.memory_space<vmem>>, vector<1x1xf32>,
    } else {
    }
    return
  }
  func.func @transform_0(%arg0: i32) -> (i32, i32) {
    %c0_i32 = arith.constant 0 : i32
    %c0_i32_0 = arith.constant 0 : i32
    return %c0_i32, %arg0 : i32, i32
  }
  func.func @transform_1(%arg0: i32) -> (i32, i32) {
    %c0_i32 = arith.constant 0 : i32
    %c0_i32_0 = arith.constant 0 : i32
    return %c0_i32, %arg0 : i32, i32
  }
  func.func @transform_2(%arg0: i32) -> (i32, i32) {
    %c0_i32 = arith.constant 0 : i32
    %c0_i32_0 = arith.constant 0 : i32
    %c0_i32_1 = arith.constant 0 : i32
    return %c0_i32, %c0_i32_0 : i32, i32
  }
}

</mosaic_0001>

<bundles_post_ra>
// kernel: tpu_custom_call.1
= control target key start
LH: loop header
LB: loop body
LE: loop exit
PB: predicated region body
PF: predicated region fallthrough
CT: control target
= control target key end

     0   :  { %7 = vsyncpa [#allocation4], 0  ;;  %s237_s0 = inlined_call_operand.hbm [shape: f32[1,8], index: 0, kind: input, shape index: {}]   ;;  %s238_s1 = inlined_call_operand.hbm [shape: f32[3,8], index: 1, kind: input, shape index: {}]   ;;  %s239_s2 = inlined_call_operand.hbm [shape: f32[1,1], index: 2, kind: output, shape index: {}]  }
   0x1   :  { %8 = vsyncpa [#allocation7], 0 }
   0x2   :  { %9 = vsyncpa [#allocation5], 0  ;;  %s182_s9 = smov [#allocation3]   ;;  %s183_s11 = smov [#allocation6]  }
   0x3   :  { %s16_s10 = sshll.u32 %s182_s9, 4  ;;  %s26_s12 = sshll.u32 %s183_s11, 4  ;;  %s17_s10 = int_to_ptr.vmem [resolvable:$true] %s16_s10  ;;  %s27_s12 = int_to_ptr.vmem [resolvable:$true] %s26_s12 }
   0x4   :  { %s110_s15 = scalar_lea.hbm %s237_s0, 16 }
   0x5   :  { %p111_p0 = scmp.ne.s32.totalorder %s237_s0, %s110_s15  ;;  %p114_p1 = scmp.lt.u32.totalorder %s110_s15, %s237_s0 }
   0x7   :  { %p116_p2 = pnand %p114_p1, %p111_p0 }
   0x9   :  { %119 = shalt.err (!%p116_p2)
}
   0xa   :  { %s120_s20 = scalar_lea.vmem %s17_s10, 16  ;;  %s124_s21 = scalar_lea.vmem %s17_s10, 32 }
   0xb   :  { %p121_p3 = scmp.ne.s32.totalorder %s17_s10, %s120_s20  ;;  %p125_p4 = scmp.lt.s32.totalorder %s17_s10, %s17_s10 }
   0xc   :  { %p126_p5 = scmp.lt.s32.totalorder %s124_s21, %s120_s20 }
   0xe   :  { %p127_p6 = por %p126_p5, %p125_p4 }
  0x10   :  { %p128_p7 = pnand %p127_p6, %p121_p3 }
  0x12   :  { %131 = shalt.err (!%p128_p7)
}
  0x13   :  { %19 = dma.hbm_to_vmem [thread:$0]  %s237_s0, 16, %s17_s10, [#allocation4]  }
  0x14   :  { %s132_s26 = scalar_lea.hbm %s238_s1, 64 }
  0x15   :  { %p133_p8 = scmp.ne.s32.totalorder %s238_s1, %s132_s26  ;;  %p136_p9 = scmp.lt.u32.totalorder %s132_s26, %s238_s1 }
  0x17   :  { %p138_p10 = pnand %p136_p9, %p133_p8 }
  0x19   :  { %141 = shalt.err (!%p138_p10)
}
  0x1a   :  { %s142_s3 = scalar_lea.vmem %s27_s12, 64  ;;  %p147_p12 = scmp.lt.s32.totalorder %s27_s12, %s27_s12 }
  0x1b   :  { %p143_p11 = scmp.ne.s32.totalorder %s27_s12, %s142_s3  ;;  %p148_p13 = scmp.lt.s32.totalorder %s142_s3, %s142_s3 }
  0x1d   :  { %p149_p0 = por %p148_p13, %p147_p12 }
  0x1f   :  { %p150_p1 = pnand %p149_p0, %p143_p11 }
  0x21   :  { %153 = shalt.err (!%p150_p1)
}
  0x22   :  { %29 = dma.hbm_to_vmem [thread:$0]  %s238_s1, 64, %s27_s12, [#allocation7]  }
  0x23   :  { %176 = dma.done.wait [#allocation4], 16  }
  0x24   :  { %177 = vsyncadd [#allocation4], 4294967280 }
  0x25   :  { %178 = dma.done.wait [#allocation7], 64  }
  0x26   :  { %179 = vsyncadd [#allocation7], 4294967232  ;;  %v184_v0 = vmov 0.0   ;;  %v41_v1 = vld [vmem:[#allocation3] sm:$0x1]  ;;  %v59_v4 = vlaneseq  ;;  %vm73_vm1 = vcmask 1040384  }
  0x27   :  { %40 = vst [vmem:[#allocation2] sm:$0x1] %v184_v0  ;;  %v42_v2 = vld [vmem:[#allocation6] sm:$0x1]  ;;  %v47_v3 = vld [vmem:[#allocation6 + $0x1] sm:$0x1] }
  0x28   :  { %v43_v5 = vsub.f32 %v41_v1, %v42_v2  ;;  %v48_v6 = vsub.f32 %v41_v1, %v47_v3  ;;  %v53_v7 = vld [vmem:[#allocation6 + $0x2] sm:$0x1]  ;;  %v60_v15 = vand.u32 127, %v59_v4  ;;  %s185_s1 = smov [#allocation8]   ;;  %vm86_vm2 = vcmask 0  }
  0x29   :  { %v54_v8 = vsub.f32 %v41_v1, %v53_v7  ;;  %s94_s5 = sshll.u32 %s185_s1, 4  ;;  %s95_s5 = int_to_ptr.vmem [resolvable:$true] %s94_s5 }
  0x2a   :  { %v44_v9 = vmul.f32 0.1, %v43_v5  ;;  %v45_v10 = vmul.f32 -0.9, %v43_v5  ;;  %v49_v11 = vmul.f32 0.5, %v48_v6  ;;  %v50_v12 = vmul.f32 -0.5, %v48_v6  ;;  %p159_p3 = scmp.lt.s32.totalorder %s95_s5, %s95_s5 }
  0x2b   :  { %v55_v13 = vmul.f32 0.9, %v54_v8  ;;  %v56_v14 = vmul.f32 -0.1, %v54_v8  ;;  %vm64_vm0 = vcmp.lt.s32.totalorder %v60_v15, 8  ;;  %s154_s7 = scalar_lea.vmem %s95_s5, 16 }
  0x2c   :  { %v46_v16 = vmax.f32 %v44_v9, %v45_v10  ;;  %v51_v17 = vmax.f32 %v49_v11, %v50_v12  ;;  %p155_p2 = scmp.ne.s32.totalorder %s95_s5, %s154_s7  ;;  %s158_s8 = scalar_lea.vmem %s95_s5, 32 }
  0x2d   :  { %v57_v18 = vmax.f32 %v55_v13, %v56_v14  ;;  %p160_p4 = scmp.lt.s32.totalorder %s158_s8, %s154_s7 }
  0x2e   :  { %v52_v19 = vadd.f32 %v51_v17, %v46_v16  ;;  %v66_v21 = vld [vmem:[#allocation2] sm:$0x1] }
  0x2f   :  { %p161_p5 = por %p160_p4, %p159_p3 }
  0x30   :  { %v58_v20 = vadd.f32 %v57_v18, %v52_v19 }
  0x31   :  { %p162_p6 = pnand %p161_p5, %p155_p2 }
  0x32   :  { %v65_v22 = vsel %vm64_vm0, %v58_v20, 0.0 }
  0x33   :  { %v67_v23 = vadd.f32 %v66_v21, %v65_v22 }
  0x35   :  { %68 = vst [vmem:[#allocation2] sm:$0x1] %v67_v23 }
  0x3c   :  { %v72_v24 = vld [vmem:[#allocation2] sm:$0x1] }
  0x3d   :  { %v74_v25 = vsel %vm73_vm1, %v72_v24, 0.0 }
  0x3e   :  { %75 = vadd.xlane.f32.xlu0 %v74_v25 }
  0xcb   :  { %v76_v26 = vpop.xlane.xlu0 %75 }
  0xcc   :  { %v77_v27 = vrot.slane %v76_v26, 4 }
  0xce   :  { %v78_v28 = vadd.f32 %v77_v27, %v76_v26 }
  0xd0   :  { %v79_v29 = vrot.slane %v78_v28, 2 }
  0xd2   :  { %v80_v30 = vadd.f32 %v79_v29, %v78_v28 }
  0xd4   :  { %v81_v31 = vrot.slane %v80_v30, 1 }
  0xd6   :  { %v82_v32 = vadd.f32 %v81_v31, %v80_v30 }
  0xd8   :  { %104 = vpush %v82_v32 }
 0x109   :  { %s105_s6 = spop %104 }
 0x10a   :  { %v84_v33 = vstv %s105_s6 }
 0x10b   :  { %v85_v34 = vmul.f32 0.083333336, %v84_v33 }
 0x10d   :  { %87 = vst.msk [vmem:[#allocation8] sm:$0x1] %vm86_vm2, %v85_v34 }
 0x10e   :  { %165 = shalt.err (!%p162_p6)
}
 0x10f   :  { %s166_s11 = scalar_lea.hbm %s239_s2, 16 }
 0x110   :  { %p167_p7 = scmp.ne.s32.totalorder %s239_s2, %s166_s11  ;;  %p170_p8 = scmp.lt.u32.totalorder %s166_s11, %s239_s2 }
 0x112   :  { %p172_p9 = pnand %p170_p8, %p167_p7 }
 0x114   :  { %175 = shalt.err (!%p172_p9)
}
 0x115   :  { %97 = dma.vmem_to_hbm [thread:$0]  %s95_s5, 16, %s239_s2, [#allocation5]  }
 0x116   :  { %180 = dma.done.wait [#allocation5], 16  }
 0x117   :  { %181 = vsyncadd [#allocation5], 4294967280 }
 0x118   :  { %101 = vsyncpa [#allocation4], 1 }
 0x119   :  { %102 = vsyncpa [#allocation7], 1 }
 0x11a   :  { %103 = vsyncpa [#allocation5], 1 }

</bundles_post_ra>
